<compile_context>
chip_gen: v7x
topology: tpu7x:2x2x1
jax: 0.10.0
libtpu: 0.0.40
codegen_flags: <defaults>
</compile_context>

<pallas_src>
import math
import jax
import jax.numpy as jnp
from jax.experimental import pallas as pl
from jax.experimental.pallas import tpu as pltpu

NEG_SLOPE = 0.01  # nn.LeakyReLU() default negative_slope
HIDDEN = 256


def _leaky_relu(x):
    # mul + max: cheaper on the VALU than cmp + select + mul.
    return jnp.maximum(x, NEG_SLOPE * x)


def sac_value_kernel(obs_ref, w1_ref, b1_ref, w2_ref, b2_ref, w3_ref, b3_ref, out_ref):
    # obs tile -> bf16 only for the MXU operand; accumulate in f32.
    x = obs_ref[...].astype(jnp.bfloat16)                                  # [TB, D] bf16
    h1 = jnp.dot(x, w1_ref[...], preferred_element_type=jnp.float32)       # [TB, 256] f32
    h1 = _leaky_relu(h1 + b1_ref[...])                                     # f32 elementwise
    h2 = jnp.dot(h1.astype(jnp.bfloat16), w2_ref[...],
                 preferred_element_type=jnp.float32)                       # [TB, 256] f32
    h2 = _leaky_relu(h2 + b2_ref[...])                                     # f32 elementwise
    # Final 256 -> 1 layer as VPU multiply + lane reduction (avoids an N=1 MXU matmul).
    v = jnp.sum(h2 * w3_ref[...], axis=-1, keepdims=True) + b3_ref[0, 0]   # [TB, 1] f32
    out_ref[...] = v.astype(out_ref.dtype)


def sac_value_forward(obs, params, tile_b=512):
    """obs: [B, obs_dim] float32 -> value: [B, 1] float32."""
    w1, b1, w2, b2, w3, b3 = params
    B, D = obs.shape

    # Batch tile: large (default 512) to amortize the ~0.35 us per-grid-step overhead,
    # but never larger than the 8-rounded batch. Pad so the grid divides exactly.
    tb = min(tile_b, max(8, 8 * pl.cdiv(B, 8)))
    b_pad = tb * pl.cdiv(B, tb)
    if b_pad != B:
        obs = jnp.pad(obs, ((0, b_pad - B), (0, 0)))
    grid = (b_pad // tb,)

    const2d = lambda i: (0, 0)
    out = pl.pallas_call(
        sac_value_kernel,
        out_shape=jax.ShapeDtypeStruct((b_pad, 1), jnp.float32),
        grid=grid,
        in_specs=[
            pl.BlockSpec((tb, D), lambda i: (i, 0)),            # obs: batch-tiled
            pl.BlockSpec((D, HIDDEN), const2d),                 # w1: resident across steps
            pl.BlockSpec((1, HIDDEN), const2d),                 # b1: resident
            pl.BlockSpec((HIDDEN, HIDDEN), const2d),            # w2: resident
            pl.BlockSpec((1, HIDDEN), const2d),                 # b2: resident
            pl.BlockSpec((1, HIDDEN), const2d),                 # w3: resident (row vector)
            pl.BlockSpec(memory_space=pltpu.MemorySpace.SMEM),  # b3: (1,1) SMEM scalar
        ],
        out_specs=pl.BlockSpec((tb, 1), lambda i: (i, 0)),
        compiler_params=pltpu.CompilerParams(
            dimension_semantics=("parallel",),                  # megacore split on v7x
        ),
    )(obs, w1, b1, w2, b2, w3, b3)
    return out[:B]


def init_params(key, observation_dim):
    """Deterministic init mimicking PyTorch nn.Linear default
    (U[-1/sqrt(fan_in), 1/sqrt(fan_in)]).  W1/W2 stored [in, out] in bf16 (MXU operands);
    biases f32; final layer weight stored as a [1, 256] f32 row vector, bias as [1, 1] f32."""
    dims = [(observation_dim, HIDDEN), (HIDDEN, HIDDEN), (HIDDEN, 1)]
    keys = jax.random.split(key, 2 * len(dims))
    params = []
    for i, (fan_in, fan_out) in enumerate(dims):
        bound = 1.0 / math.sqrt(fan_in)
        w = jax.random.uniform(keys[2 * i], (fan_in, fan_out),
                               minval=-bound, maxval=bound, dtype=jnp.float32)
        b = jax.random.uniform(keys[2 * i + 1], (1, fan_out),
                               minval=-bound, maxval=bound, dtype=jnp.float32)
        if i < 2:
            params += [w.astype(jnp.bfloat16), b]       # MXU layers: bf16 weights, f32 bias
        else:
            params += [w.reshape(1, fan_in), b]         # w3 as [1, 256] f32, b3 as [1, 1] f32
    return tuple(params)


def reference_forward(obs, params):
    """Plain-JAX reference with identical dtype handling (bf16 matmul operands, f32 accum)."""
    w1, b1, w2, b2, w3, b3 = params
    h1 = _leaky_relu(jnp.dot(obs.astype(jnp.bfloat16), w1,
                             preferred_element_type=jnp.float32) + b1)
    h2 = _leaky_relu(jnp.dot(h1.astype(jnp.bfloat16), w2,
                             preferred_element_type=jnp.float32) + b2)
    return jnp.sum(h2 * w3, axis=-1, keepdims=True) + b3[0, 0]


if __name__ == "__main__":
    key = jax.random.PRNGKey(0)
    k_obs, k_params = jax.random.split(key)

    batch = 8
    observation_dim = 16
    obs = jax.random.normal(k_obs, (batch, observation_dim), dtype=jnp.float32)
    params = init_params(k_params, observation_dim)

    value = sac_value_forward(obs, params)
    jax.block_until_ready(value)

    ref = reference_forward(obs, params)
    assert value.shape == (batch, 1)
    assert jnp.allclose(value, ref, atol=2e-3, rtol=2e-3), (
        f"max abs diff {jnp.max(jnp.abs(value - ref))}")

    print("KERNEL_OK")
</pallas_src>

<mosaic_0001>
module attributes {stable_mosaic.version = 11 : i64} {
  func.func @sac_value_kernel(%arg0: i32, %arg1: memref<8x16xf32, #tpu.memory_space<vmem>>, %arg2: memref<16x256xbf16, #tpu.memory_space<vmem>>, %arg3: memref<1x256xf32, #tpu.memory_space<vmem>>, %arg4: memref<256x256xbf16, #tpu.memory_space<vmem>>, %arg5: memref<1x256xf32, #tpu.memory_space<vmem>>, %arg6: memref<1x256xf32, #tpu.memory_space<vmem>>, %arg7: memref<1x1xf32, #tpu.memory_space<smem>>, %arg8: memref<8x1xf32, #tpu.memory_space<vmem>>) attributes {dimension_semantics = [#tpu.dimension_semantics<parallel>], iteration_bounds = array<i64: 1>, scalar_prefetch = 0 : i64, scratch_operands = 0 : i64, tpu.core_type = #tpu.core_type<tc>, window_params = [{transform_indices = @transform_0, window_bounds = array<i64: 8, 16>}, {pipeline_mode = #tpu.pipeline_mode<synchronous>, transform_indices = @transform_1, window_bounds = array<i64: 16, 256>}, {pipeline_mode = #tpu.pipeline_mode<synchronous>, transform_indices = @transform_2, window_bounds = array<i64: 1, 256>}, {pipeline_mode = #tpu.pipeline_mode<synchronous>, transform_indices = @transform_3, window_bounds = array<i64: 256, 256>}, {pipeline_mode = #tpu.pipeline_mode<synchronous>, transform_indices = @transform_4, window_bounds = array<i64: 1, 256>}, {pipeline_mode = #tpu.pipeline_mode<synchronous>, transform_indices = @transform_5, window_bounds = array<i64: 1, 256>}, {transform_indices = @transform_6, window_bounds = array<i64: 1, 1>}, {transform_indices = @transform_7, window_bounds = array<i64: 8, 1>}]} {
    %c0 = arith.constant 0 : index
    %c0_0 = arith.constant 0 : index
    %0 = vector.load %arg1[%c0, %c0_0] : memref<8x16xf32, #tpu.memory_space<vmem>>, vector<8x16xf32>
    %1 = arith.truncf %0 : vector<8x16xf32> to vector<8x16xbf16>
    %c0_1 = arith.constant 0 : index
    %c0_2 = arith.constant 0 : index
    %2 = vector.load %arg2[%c0_1, %c0_2] : memref<16x256xbf16, #tpu.memory_space<vmem>>, vector<16x256xbf16>
    %cst = arith.constant dense<0.000000e+00> : vector<8x256xf32>
    %3 = tpu.matmul %1, %2, %cst {dimension_numbers = #tpu.dot_dimension_numbers<[1], [0], [0], [1], [0, 0, 1, 1], [], []>} : vector<8x16xbf16>, vector<16x256xbf16>, vector<8x256xf32> -> vector<8x256xf32>
    %c0_3 = arith.constant 0 : index
    %c0_4 = arith.constant 0 : index
    %4 = vector.load %arg3[%c0_3, %c0_4] : memref<1x256xf32, #tpu.memory_space<vmem>>, vector<1x256xf32>
    %5 = vector.broadcast %4 : vector<1x256xf32> to vector<8x256xf32>
    %6 = arith.addf %3, %5 : vector<8x256xf32>
    %cst_5 = arith.constant 0.00999999977 : f32
    %7 = vector.broadcast %cst_5 : f32 to vector<8x256xf32>
    %8 = arith.mulf %7, %6 : vector<8x256xf32>
    %9 = arith.maximumf %6, %8 : vector<8x256xf32>
    %10 = arith.truncf %9 : vector<8x256xf32> to vector<8x256xbf16>
    %c0_6 = arith.constant 0 : index
    %c0_7 = arith.constant 0 : index
    %11 = vector.load %arg4[%c0_6, %c0_7] : memref<256x256xbf16, #tpu.memory_space<vmem>>, vector<256x256xbf16>
    %cst_8 = arith.constant dense<0.000000e+00> : vector<8x256xf32>
    %12 = tpu.matmul %10, %11, %cst_8 {dimension_numbers = #tpu.dot_dimension_numbers<[1], [0], [0], [1], [0, 0, 1, 1], [], []>} : vector<8x256xbf16>, vector<256x256xbf16>, vector<8x256xf32> -> vector<8x256xf32>
    %c0_9 = arith.constant 0 : index
    %c0_10 = arith.constant 0 : index
    %13 = vector.load %arg5[%c0_9, %c0_10] : memref<1x256xf32, #tpu.memory_space<vmem>>, vector<1x256xf32>
    %14 = vector.broadcast %13 : vector<1x256xf32> to vector<8x256xf32>
    %15 = arith.addf %12, %14 : vector<8x256xf32>
    %cst_11 = arith.constant 0.00999999977 : f32
    %16 = vector.broadcast %cst_11 : f32 to vector<8x256xf32>
    %17 = arith.mulf %16, %15 : vector<8x256xf32>
    %18 = arith.maximumf %15, %17 : vector<8x256xf32>
    %c0_12 = arith.constant 0 : index
    %c0_13 = arith.constant 0 : index
    %19 = vector.load %arg6[%c0_12, %c0_13] : memref<1x256xf32, #tpu.memory_space<vmem>>, vector<1x256xf32>
    %20 = vector.broadcast %19 : vector<1x256xf32> to vector<8x256xf32>
    %21 = arith.mulf %18, %20 : vector<8x256xf32>
    %cst_14 = arith.constant dense<0.000000e+00> : vector<8xf32>
    %22 = vector.multi_reduction <add>, %21, %cst_14 [1] : vector<8x256xf32> to vector<8xf32>
    %23 = vector.shape_cast %22 : vector<8xf32> to vector<8x1xf32>
    %c0_15 = arith.constant 0 : index
    %c0_16 = arith.constant 0 : index
    %24 = memref.load %arg7[%c0_15, %c0_16] : memref<1x1xf32, #tpu.memory_space<smem>>
    %25 = vector.broadcast %24 : f32 to vector<8x1xf32>
    %26 = arith.addf %23, %25 : vector<8x1xf32>
    %c0_17 = arith.constant 0 : index
    %c0_18 = arith.constant 0 : index
    %27 = vector.load %arg8[%c0_17, %c0_18] : memref<8x1xf32, #tpu.memory_space<vmem>>, vector<8x1xf32>
    tpu.vector_store %arg8[%c0_17, %c0_18], %26 {strides = array<i32>} : memref<8x1xf32, #tpu.memory_space<vmem>>, vector<8x1xf32>,
    return
  }
  func.func @transform_0(%arg0: i32) -> (i32, i32) {
    %c0_i32 = arith.constant 0 : i32
    %c0_i32_0 = arith.constant 0 : i32
    return %arg0, %c0_i32 : i32, i32
  }
  func.func @transform_1(%arg0: i32) -> (i32, i32) {
    %c0_i32 = arith.constant 0 : i32
    %c0_i32_0 = arith.constant 0 : i32
    %c0_i32_1 = arith.constant 0 : i32
    return %c0_i32, %c0_i32_0 : i32, i32
  }
  func.func @transform_2(%arg0: i32) -> (i32, i32) {
    %c0_i32 = arith.constant 0 : i32
    %c0_i32_0 = arith.constant 0 : i32
    %c0_i32_1 = arith.constant 0 : i32
    return %c0_i32, %c0_i32_0 : i32, i32
  }
  func.func @transform_3(%arg0: i32) -> (i32, i32) {
    %c0_i32 = arith.constant 0 : i32
    %c0_i32_0 = arith.constant 0 : i32
    %c0_i32_1 = arith.constant 0 : i32
    return %c0_i32, %c0_i32_0 : i32, i32
  }
  func.func @transform_4(%arg0: i32) -> (i32, i32) {
    %c0_i32 = arith.constant 0 : i32
    %c0_i32_0 = arith.constant 0 : i32
    %c0_i32_1 = arith.constant 0 : i32
    return %c0_i32, %c0_i32_0 : i32, i32
  }
  func.func @transform_5(%arg0: i32) -> (i32, i32) {
    %c0_i32 = arith.constant 0 : i32
    %c0_i32_0 = arith.constant 0 : i32
    %c0_i32_1 = arith.constant 0 : i32
    return %c0_i32, %c0_i32_0 : i32, i32
  }
  func.func @transform_6(%arg0: i32) -> (i32, i32) {
    %c0_i32 = arith.constant 0 : i32
    %c0_i32_0 = arith.constant 0 : i32
    %c0_i32_1 = arith.constant 0 : i32
    return %c0_i32, %c0_i32_0 : i32, i32
  }
  func.func @transform_7(%arg0: i32) -> (i32, i32) {
    %c0_i32 = arith.constant 0 : i32
    %c0_i32_0 = arith.constant 0 : i32
    return %arg0, %c0_i32 : i32, i32
  }
}

</mosaic_0001>

<bundles_post_ra>
// kernel: tpu_custom_call.1
= control target key start
LH: loop header
LB: loop body
LE: loop exit
PB: predicated region body
PF: predicated region fallthrough
CT: control target
= control target key end

     0   :  { %13 = vsyncpa [#allocation4], 0  ;;  %s686_s0 = inlined_call_operand.hbm [shape: f32[8,16], index: 0, kind: input, shape index: {}]   ;;  %s687_s1 = inlined_call_operand.hbm [shape: bf16[16,256], index: 1, kind: input, shape index: {}]   ;;  %s688_s2 = inlined_call_operand.vmem [shape: f32[1,256], index: 2, kind: input, shape index: {}]   ;;  %s689_s3 = inlined_call_operand.hbm [shape: bf16[256,256], index: 3, kind: input, shape index: {}]   ;;  %s690_s4 = inlined_call_operand.vmem [shape: f32[1,256], index: 4, kind: input, shape index: {}]   ;;  %s691_s5 = inlined_call_operand.vmem [shape: f32[1,256], index: 5, kind: input, shape index: {}]   ;;  %s692_s6 = inlined_call_operand.<no memory space> [shape: f32[1,1], index: 6, kind: input, shape index: {}]   ;;  %s693_s7 = inlined_call_operand.vmem [shape: f32[8,1], index: 7, kind: output, shape index: {}]  }
   0x1   :  { %14 = vsyncpa [#allocation6], 0  ;;  %s583_s24 = smov [#allocation5]   ;;  %s513_s28 = scalar_lea.hbm %s687_s1, 256 }
   0x2   :  { %s30_s25 = sshll.u32 %s583_s24, 4  ;;  %p514_p0 = scmp.ne.s32.totalorder %s687_s1, %s513_s28  ;;  %s31_s25 = int_to_ptr.vmem [resolvable:$true] %s30_s25 }
   0x3   :  { %p517_p1 = scmp.lt.u32.totalorder %s513_s28, %s687_s1 }
   0x5   :  { %p519_p2 = pnand %p517_p1, %p514_p0 }
   0x7   :  { %522 = shalt.err (!%p519_p2)
}
   0x8   :  { %s523_s10 = scalar_lea.vmem %s31_s25, 256  ;;  %p528_p4 = scmp.lt.s32.totalorder %s31_s25, %s31_s25 }
   0x9   :  { %p524_p3 = scmp.ne.s32.totalorder %s31_s25, %s523_s10  ;;  %p529_p5 = scmp.lt.s32.totalorder %s523_s10, %s523_s10 }
   0xb   :  { %p530_p6 = por %p529_p5, %p528_p4 }
   0xd   :  { %p531_p7 = pnand %p530_p6, %p524_p3 }
   0xf   :  { %534 = shalt.err (!%p531_p7)
}
  0x10   :  { %s584_s11 = smov 128   ;;  %s585_s12 = smov 8  }
  0x11   :  { %36 = dma.hbm_to_vmem [thread:$0]  %s687_s1, 256, %s31_s25, [#allocation6], %s584_s11, %s584_s11, %s585_s12  }
  0x12   :  { %s586_s15 = smov [#allocation3]   ;;  %s587_s17 = smov [#allocation7]  }
  0x13   :  { %s21_s16 = sshll.u32 %s586_s15, 4  ;;  %s44_s18 = sshll.u32 %s587_s17, 4  ;;  %s22_s16 = int_to_ptr.vmem [resolvable:$true] %s21_s16  ;;  %s45_s18 = int_to_ptr.vmem [resolvable:$true] %s44_s18 }
  0x14   :  { %s535_s21 = scalar_lea.hbm %s686_s0, 128 }
  0x15   :  { %p536_p8 = scmp.ne.s32.totalorder %s686_s0, %s535_s21  ;;  %p539_p9 = scmp.lt.u32.totalorder %s535_s21, %s686_s0 }
  0x17   :  { %p541_p10 = pnand %p539_p9, %p536_p8 }
  0x19   :  { %544 = shalt.err (!%p541_p10)
}
  0x1a   :  { %s545_s1 = scalar_lea.vmem %s22_s16, 128  ;;  %p550_p12 = scmp.lt.s32.totalorder %s22_s16, %s22_s16 }
  0x1b   :  { %p546_p11 = scmp.ne.s32.totalorder %s22_s16, %s545_s1  ;;  %p551_p13 = scmp.lt.s32.totalorder %s545_s1, %s545_s1 }
  0x1d   :  { %p552_p0 = por %p551_p13, %p550_p12 }
  0x1f   :  { %p553_p1 = pnand %p552_p0, %p546_p11 }
  0x21   :  { %556 = shalt.err (!%p553_p1)
}
  0x22   :  { %24 = dma.hbm_to_vmem [thread:$0]  %s686_s0, 128, %s22_s16, [#allocation4]  }
  0x23   :  { %s557_s30 = scalar_lea.hbm %s689_s3, 4096 }
  0x24   :  { %p558_p2 = scmp.ne.s32.totalorder %s689_s3, %s557_s30  ;;  %p561_p3 = scmp.lt.u32.totalorder %s557_s30, %s689_s3 }
  0x26   :  { %p563_p4 = pnand %p561_p3, %p558_p2 }
  0x28   :  { %566 = shalt.err (!%p563_p4)
}
  0x29   :  { %s567_s14 = scalar_lea.vmem %s45_s18, 4096  ;;  %p572_p6 = scmp.lt.s32.totalorder %s45_s18, %s45_s18 }
  0x2a   :  { %p568_p5 = scmp.ne.s32.totalorder %s45_s18, %s567_s14  ;;  %p573_p7 = scmp.lt.s32.totalorder %s567_s14, %s567_s14 }
  0x2c   :  { %p574_p8 = por %p573_p7, %p572_p6 }
  0x2e   :  { %p575_p9 = pnand %p574_p8, %p568_p5 }
  0x30   :  { %578 = shalt.err (!%p575_p9)
}
  0x31   :  { %50 = dma.hbm_to_vmem [thread:$0]  %s689_s3, 4096, %s45_s18, [#allocation6], %s584_s11, %s584_s11, %s585_s12  }
  0x32   :  { %579 = dma.done.wait [#allocation4], 128  }
  0x33   :  { %580 = vsyncadd [#allocation4], 4294967168 }
  0x34   :  { %581 = dma.done.wait [#allocation6], 4352  }
  0x35   :  { %582 = vsyncadd [#allocation6], 4294962944  ;;  %v588_v0 = vmov 0   ;;  %v462_v1 = vld [vmem:[#allocation5 + $0x4] ss:$8 sps:$4 sm:$0xff]   ;;  %v67_v3 = vld [vmem:[#allocation3] sm:$0xff]  ;;  %v73_v37 = vlaneseq }
  0x36   :  { %129 = vmatprep.mubr.bf16.mxu0 %v588_v0  ;;  %v464_v2 = vld [vmem:[#allocation5] ss:$8 sps:$4 sm:$0xff]   ;;  %97 = vmatprep.subr.bf16.mxu0 %v462_v1  ;;  %v68_v4 = vpack.c.bf16 %v67_v3, %v67_v3  ;;  %v465_v5 = vld [vmem:[#allocation7 + $0x4] ss:$8 sps:$4 sm:$0xff]   ;;  %v467_v6 = vld [vmem:[#allocation7] ss:$8 sps:$4 sm:$0xff]  }
  0x37   :  { %98 = vmatpush1.bf16.msra.mxu0 %v464_v2  ;;  %vm93_vm0 = vcmask 130048   ;;  %v468_v7 = vld [vmem:[#allocation7 + $0x14] ss:$8 sps:$4 sm:$0xff]   ;;  %348 = vmatprep.subr.bf16.mxu1 %v465_v5  ;;  %v470_v8 = vld [vmem:[#allocation7 + $0x10] ss:$8 sps:$4 sm:$0xff]   ;;  %v74_v38 = vshrl.u32 %v73_v37, 7 }
  0x38   :  { %349 = vmatpush1.bf16.msra.mxu1 %v467_v6  ;;  %v471_v9 = vld [vmem:[#allocation7 + $0x24] ss:$8 sps:$4 sm:$0xff]   ;;  %v473_v10 = vld [vmem:[#allocation7 + $0x20] ss:$8 sps:$4 sm:$0xff]   ;;  %v474_v11 = vld [vmem:[#allocation7 + $0x34] ss:$8 sps:$4 sm:$0xff]  }
  0x39   :  { %350 = vmatprep.subr.bf16.mxu1 %v468_v7  ;;  %v476_v12 = vld [vmem:[#allocation7 + $0x30] ss:$8 sps:$4 sm:$0xff]   ;;  %v477_v13 = vld [vmem:[#allocation7 + $0x44] ss:$8 sps:$4 sm:$0xff]   ;;  %v479_v14 = vld [vmem:[#allocation7 + $0x40] ss:$8 sps:$4 sm:$0xff]  }
  0x3a   :  { %423 = vmatmul.mubr.msk.bf16.vlgmr.msra.gmra.mrb[0].mxu0 %vm93_vm0, %v68_v4  ;;  %v480_v15 = vld [vmem:[#allocation7 + $0x54] ss:$8 sps:$4 sm:$0xff]   ;;  %v482_v16 = vld [vmem:[#allocation7 + $0x50] ss:$8 sps:$4 sm:$0xff]   ;;  %v483_v17 = vld [vmem:[#allocation7 + $0x64] ss:$8 sps:$4 sm:$0xff]  }
  0x3b   :  { %v485_v18 = vld [vmem:[#allocation7 + $0x60] ss:$8 sps:$4 sm:$0xff]   ;;  %v486_v19 = vld [vmem:[#allocation7 + $0x74] ss:$8 sps:$4 sm:$0xff]   ;;  %v488_v20 = vld [vmem:[#allocation7 + $0x70] ss:$8 sps:$4 sm:$0xff]  }
  0x3c   :  { %351 = vmatpush1.bf16.msra.mxu1 %v470_v8  ;;  %v489_v21 = vld [vmem:[#allocation7 + $0x84] ss:$8 sps:$4 sm:$0xff]   ;;  %v491_v22 = vld [vmem:[#allocation7 + $0x80] ss:$8 sps:$4 sm:$0xff]   ;;  %v492_v23 = vld [vmem:[#allocation7 + $0x94] ss:$8 sps:$4 sm:$0xff]  }
  0x3d   :  { %352 = vmatprep.subr.bf16.mxu1 %v471_v9  ;;  %v494_v24 = vld [vmem:[#allocation7 + $0x90] ss:$8 sps:$4 sm:$0xff]   ;;  %v495_v25 = vld [vmem:[#allocation7 + $0xa4] ss:$8 sps:$4 sm:$0xff]   ;;  %v497_v26 = vld [vmem:[#allocation7 + $0xa0] ss:$8 sps:$4 sm:$0xff]  }
  0x3e   :  { %v498_v27 = vld [vmem:[#allocation7 + $0xb4] ss:$8 sps:$4 sm:$0xff]   ;;  %v500_v28 = vld [vmem:[#allocation7 + $0xb0] ss:$8 sps:$4 sm:$0xff]   ;;  %v501_v29 = vld [vmem:[#allocation7 + $0xc4] ss:$8 sps:$4 sm:$0xff]  }
  0x3f   :  { %v503_v30 = vld [vmem:[#allocation7 + $0xc0] ss:$8 sps:$4 sm:$0xff]   ;;  %v504_v31 = vld [vmem:[#allocation7 + $0xd4] ss:$8 sps:$4 sm:$0xff]   ;;  %v506_v32 = vld [vmem:[#allocation7 + $0xd0] ss:$8 sps:$4 sm:$0xff]  }
  0x40   :  { %353 = vmatpush1.bf16.msra.mxu1 %v473_v10  ;;  %v507_v33 = vld [vmem:[#allocation7 + $0xe4] ss:$8 sps:$4 sm:$0xff]   ;;  %v509_v34 = vld [vmem:[#allocation7 + $0xe0] ss:$8 sps:$4 sm:$0xff]   ;;  %v510_v35 = vld [vmem:[#allocation7 + $0xf4] ss:$8 sps:$4 sm:$0xff]  }
  0x41   :  { %354 = vmatprep.subr.bf16.mxu1 %v474_v11  ;;  %v512_v36 = vld [vmem:[#allocation7 + $0xf0] ss:$8 sps:$4 sm:$0xff]   ;;  %v75_v39 = vsub.s32 0, %v74_v38  ;;  %v71_v40 = vld [vmem:[%s688_s2] sm:$0x3]  ;;  %v79_v41 = vsub.s32 1, %v74_v38  ;;  %v411_v11 = vstv %s692_s6 }
  0x42   :  { %v176_v56 = vld [vmem:[%s690_s4] sm:$0x3]  ;;  %vm413_vm1 = vcmask 7168  }
  0x43   :  { %v76_v42 = vrot.slane %v71_v40, %v75_v39  ;;  %v80_v43 = vrot.slane %v71_v40, %v79_v41  ;;  %v181_v57 = vrot.slane %v176_v56, %v75_v39  ;;  %v185_v58 = vrot.slane %v176_v56, %v79_v41  ;;  %v393_v60 = vld [vmem:[%s691_s5] sm:$0x3] }
  0x44   :  { %355 = vmatpush1.bf16.msra.mxu1 %v476_v12  ;;  %v398_v3 = vrot.slane %v393_v60, %v75_v39  ;;  %v402_v5 = vrot.slane %v393_v60, %v79_v41 }
  0x45   :  { %356 = vmatprep.subr.bf16.mxu1 %v477_v13 }
  0x48   :  { %357 = vmatpush1.bf16.msra.mxu1 %v479_v14 }
  0x49   :  { %358 = vmatprep.subr.bf16.mxu1 %v480_v15 }
  0x4c   :  { %359 = vmatpush1.bf16.msra.mxu1 %v482_v16 }
  0x4d   :  { %360 = vmatprep.subr.bf16.mxu1 %v483_v17 }
  0x50   :  { %361 = vmatpush1.bf16.msra.mxu1 %v485_v18 }
  0x51   :  { %362 = vmatprep.subr.bf16.mxu1 %v486_v19 }
  0x54   :  { %363 = vmatpush1.bf16.msra.mxu1 %v488_v20 }
  0x55   :  { %364 = vmatprep.subr.bf16.mxu1 %v489_v21 }
  0x58   :  { %365 = vmatpush1.bf16.msra.mxu1 %v491_v22 }
  0x59   :  { %366 = vmatprep.subr.bf16.mxu1 %v492_v23 }
  0x5c   :  { %367 = vmatpush1.bf16.msra.mxu1 %v494_v24 }
  0x5d   :  { %368 = vmatprep.subr.bf16.mxu1 %v495_v25 }
  0x60   :  { %369 = vmatpush1.bf16.msra.mxu1 %v497_v26 }
  0x61   :  { %370 = vmatprep.subr.bf16.mxu1 %v498_v27 }
  0x64   :  { %371 = vmatpush1.bf16.msra.mxu1 %v500_v28 }
  0x65   :  { %372 = vmatprep.subr.bf16.mxu1 %v501_v29 }
  0x68   :  { %373 = vmatpush1.bf16.msra.mxu1 %v503_v30 }
  0x69   :  { %374 = vmatprep.subr.bf16.mxu1 %v504_v31 }
  0x6c   :  { %375 = vmatpush1.bf16.msra.mxu1 %v506_v32 }
  0x6d   :  { %376 = vmatprep.subr.bf16.mxu1 %v507_v33 }
  0x70   :  { %377 = vmatpush1.bf16.msra.mxu1 %v509_v34 }
  0x71   :  { %378 = vmatprep.subr.bf16.mxu1 %v510_v35 }
  0x74   :  { %379 = vmatpush1.bf16.msra.mxu1 %v512_v36 }
 0x10d   :  { %v131_v44 = vpop.f32.mrb[0].mxu0 }
 0x10e   :  { %v132_v45 = vadd.f32 %v131_v44, %v76_v42  ;;  %v133_v46 = vpop.f32.mrb[1].mxu0 }
 0x10f   :  { %v134_v47 = vadd.f32 %v133_v46, %v80_v43  ;;  %v135_v48 = vpop.f32.mrb[2].mxu0 }
 0x110   :  { %v138_v49 = vmul.f32 0.01, %v132_v45  ;;  %v136_v50 = vpop.f32.mrb[3].mxu0 }
 0x111   :  { %v139_v51 = vmul.f32 0.01, %v134_v47 }
 0x112   :  { %v140_v52 = vmax.f32 %v132_v45, %v138_v49 }
 0x113   :  { %v141_v53 = vmax.f32 %v134_v47, %v139_v51 }
 0x114   :  { %v142_v55 = vpack.c.bf16 %v140_v52, %v140_v52 }
 0x115   :  { %v143_v54 = vpack.c.bf16 %v141_v53, %v141_v53 }
 0x117   :  { %380 = vmatprep.mubr.bf16.mxu1 %v143_v54 }
 0x118   :  { %381 = vmatmul.mubr.bf16.vlgmr.msra.gmra.mrb[0].mxu1 %v142_v55 }
 0x1eb   :  { %v382_v59 = vpop.f32.mrb[0].mxu1 }
 0x1ec   :  { %v383_v61 = vadd.f32 %v382_v59, %v181_v57  ;;  %v384_v62 = vpop.f32.mrb[1].mxu1 }
 0x1ed   :  { %v385_v63 = vadd.f32 %v384_v62, %v185_v58  ;;  %v386_v0 = vpop.f32.mrb[2].mxu1 }
 0x1ee   :  { %v389_v1 = vmul.f32 0.01, %v383_v61  ;;  %v387_v2 = vpop.f32.mrb[3].mxu1 }
 0x1ef   :  { %v390_v4 = vmul.f32 0.01, %v385_v63 }
 0x1f0   :  { %v391_v6 = vmax.f32 %v383_v61, %v389_v1 }
 0x1f1   :  { %v392_v7 = vmax.f32 %v385_v63, %v390_v4 }
 0x1f2   :  { %v405_v8 = vmul.f32 %v398_v3, %v391_v6 }
 0x1f3   :  { %v406_v9 = vmul.f32 %v402_v5, %v392_v7 }
 0x1f5   :  { %v407_v10 = vadd.f32 %v406_v9, %v405_v8 }
 0x1f7   :  { %408 = vadd.xlane.f32.xlu0 %v407_v10 }
 0x284   :  { %v409_v12 = vpop.xlane.xlu0 %408 }
 0x285   :  { %v412_v13 = vadd.f32 %v411_v11, %v409_v12 }
 0x287   :  { %414 = vst.msk [vmem:[%s693_s7] sm:$0xff] %vm413_vm1, %v412_v13 }
 0x288   :  { %419 = vsyncpa [#allocation4], 1 }
 0x289   :  { %420 = vsyncpa [#allocation6], 1 }

</bundles_post_ra>
